<compile_context>
chip_gen: v7x
topology: tpu7x:2x2x1
jax: 0.10.0
libtpu: 0.0.40
codegen_flags: <defaults>
</compile_context>

<pallas_src>
import math
import functools

import jax
import jax.numpy as jnp
from jax.experimental import pallas as pl
from jax.experimental.pallas import tpu as pltpu


def _round_up(v, m):
    return (v + m - 1) // m * m


def _mlp_kernel(x_ref, w1_ref, b1_ref, w2_ref, b2_ref, o_ref):
    # fc1: x @ W1 (native dtype into MXU, f32 accumulate) + b1  -> [TM, hidden]
    h = jnp.dot(x_ref[...], w1_ref[...], preferred_element_type=jnp.float32)
    h = h + b1_ref[...].astype(jnp.float32)          # b1: [1, hidden]

    # Dropout(p=0.1) in eval mode == identity.

    # Exact GELU (PyTorch nn.GELU default): 0.5 * x * (1 + erf(x / sqrt(2)))
    h = 0.5 * h * (1.0 + jax.lax.erf(h * (1.0 / math.sqrt(2.0))))

    # fc2: feed the MXU in the weight's native dtype, accumulate in f32.
    h = h.astype(w2_ref.dtype)
    o = jnp.dot(h, w2_ref[...], preferred_element_type=jnp.float32)
    o = o + b2_ref[...].astype(jnp.float32)          # b2: [1, cout]

    # Dropout(p=0.1) in eval mode == identity.
    o_ref[...] = o.astype(o_ref.dtype)


@functools.partial(jax.jit, static_argnames=("tm",))
def mlp_pallas(x, w1_t, b1, w2_t, b2, *, tm=512):
    """x: [..., Cin]; w1_t: [Cin, 2*Cout]; b1: [2*Cout];
       w2_t: [2*Cout, Cout]; b2: [Cout]  ->  [..., Cout]."""
    cin = x.shape[-1]
    hidden = w1_t.shape[1]
    cout = w2_t.shape[1]

    lead = x.shape[:-1]
    m = 1
    for d in lead:
        m *= d
    x2 = x.reshape(m, cin)

    # --- Lane-dense padding of hidden / cout to multiples of 128 ----------
    hidden_p = _round_up(hidden, 128)
    cout_p = _round_up(cout, 128)
    if hidden_p != hidden:
        w1_t = jnp.pad(w1_t, ((0, 0), (0, hidden_p - hidden)))
        b1 = jnp.pad(b1, (0, hidden_p - hidden))
        w2_t = jnp.pad(w2_t, ((0, hidden_p - hidden), (0, 0)))
    if cout_p != cout:
        w2_t = jnp.pad(w2_t, ((0, 0), (0, cout_p - cout)))
        b2 = jnp.pad(b2, (0, cout_p - cout))

    b1_2d = b1.reshape(1, hidden_p)
    b2_2d = b2.reshape(1, cout_p)

    # --- Row tile size: start at `tm`, shrink to fit a v7x-safe VMEM budget -
    x_item = jnp.dtype(x.dtype).itemsize
    w_item = jnp.dtype(w1_t.dtype).itemsize
    m8 = _round_up(max(m, 1), 8)
    tm_eff = min(_round_up(tm, 8), m8)

    def _vmem_bytes(tm_):
        return (2 * tm_ * cin * x_item            # x tiles (double-buffered)
                + 2 * tm_ * cout_p * x_item       # out tiles (double-buffered)
                + 2 * (cin * hidden_p + hidden_p * cout_p) * w_item  # weights
                + 2 * (hidden_p + cout_p) * w_item                   # biases
                + tm_ * hidden_p * 4              # live f32 intermediate h
                + (1 << 20))                      # slack

    vmem_budget = 48 * 1024 * 1024                # fits v7x's 64 MiB/TC
    while tm_eff > 8 and _vmem_bytes(tm_eff) > vmem_budget:
        tm_eff = max(8, _round_up(tm_eff // 2, 8))

    # Pad rows up to a multiple of the row tile.
    m_pad = _round_up(max(m, 1), tm_eff)
    if m_pad != m:
        x2 = jnp.pad(x2, ((0, m_pad - m), (0, 0)))

    grid = (m_pad // tm_eff,)

    out = pl.pallas_call(
        _mlp_kernel,
        out_shape=jax.ShapeDtypeStruct((m_pad, cout_p), x.dtype),
        grid_spec=pltpu.PrefetchScalarGridSpec(
            num_scalar_prefetch=0,
            grid=grid,
            in_specs=[
                pl.BlockSpec((tm_eff, cin), lambda i: (i, 0)),      # x tile
                pl.BlockSpec((cin, hidden_p), lambda i: (0, 0)),    # W1 resident
                pl.BlockSpec((1, hidden_p), lambda i: (0, 0)),      # b1 resident
                pl.BlockSpec((hidden_p, cout_p), lambda i: (0, 0)),  # W2 resident
                pl.BlockSpec((1, cout_p), lambda i: (0, 0)),        # b2 resident
            ],
            out_specs=pl.BlockSpec((tm_eff, cout_p), lambda i: (i, 0)),
        ),
        compiler_params=pltpu.CompilerParams(
            dimension_semantics=("parallel",),      # megacore-shard row tiles
            vmem_limit_bytes=vmem_budget,
        ),
    )(x2, w1_t, b1_2d, w2_t, b2_2d)

    out = out[:m, :cout]
    return out.reshape(*lead, cout)


def init_mlp_params(key, inchannels, outchannels, dtype=jnp.float32):
    """Deterministic init mirroring nn.Linear default (uniform +/- 1/sqrt(fan_in)).
    Weights returned already transposed to (in, out)."""
    hidden = outchannels * 2
    k1, k2, k3, k4 = jax.random.split(key, 4)
    lim1 = 1.0 / math.sqrt(inchannels)
    lim2 = 1.0 / math.sqrt(hidden)
    w1_t = jax.random.uniform(k1, (inchannels, hidden), dtype, -lim1, lim1)
    b1 = jax.random.uniform(k2, (hidden,), dtype, -lim1, lim1)
    w2_t = jax.random.uniform(k3, (hidden, outchannels), dtype, -lim2, lim2)
    b2 = jax.random.uniform(k4, (outchannels,), dtype, -lim2, lim2)
    return w1_t, b1, w2_t, b2


def mlp_reference(x, w1_t, b1, w2_t, b2):
    h = x @ w1_t + b1
    h = jax.nn.gelu(h, approximate=False)
    return h @ w2_t + b2


if __name__ == "__main__":
    key = jax.random.PRNGKey(0)
    kx, kp = jax.random.split(key)

    batch, seq, inchannels, outchannels = 2, 8, 32, 16
    x = jax.random.normal(kx, (batch, seq, inchannels), jnp.float32)

    w1_t, b1, w2_t, b2 = init_mlp_params(kp, inchannels, outchannels)

    out = mlp_pallas(x, w1_t, b1, w2_t, b2)
    out = jax.block_until_ready(out)

    ref = mlp_reference(x, w1_t, b1, w2_t, b2)
    assert out.shape == (batch, seq, outchannels)
    assert jnp.allclose(out, ref, atol=2e-5, rtol=2e-5), (
        f"max abs err {jnp.max(jnp.abs(out - ref))}")

    print("KERNEL_OK")
</pallas_src>

<mosaic_0001>
module attributes {stable_mosaic.version = 11 : i64} {
  func.func @_mlp_kernel(%arg0: i32, %arg1: memref<16x32xf32, #tpu.memory_space<vmem>>, %arg2: memref<32x128xf32, #tpu.memory_space<vmem>>, %arg3: memref<1x128xf32, #tpu.memory_space<vmem>>, %arg4: memref<128x128xf32, #tpu.memory_space<vmem>>, %arg5: memref<1x128xf32, #tpu.memory_space<vmem>>, %arg6: memref<16x128xf32, #tpu.memory_space<vmem>>) attributes {dimension_semantics = [#tpu.dimension_semantics<parallel>], iteration_bounds = array<i64: 1>, scalar_prefetch = 0 : i64, scratch_operands = 0 : i64, tpu.core_type = #tpu.core_type<tc>, window_params = [{transform_indices = @transform_0, window_bounds = array<i64: 16, 32>}, {pipeline_mode = #tpu.pipeline_mode<synchronous>, transform_indices = @transform_1, window_bounds = array<i64: 32, 128>}, {pipeline_mode = #tpu.pipeline_mode<synchronous>, transform_indices = @transform_2, window_bounds = array<i64: 1, 128>}, {pipeline_mode = #tpu.pipeline_mode<synchronous>, transform_indices = @transform_3, window_bounds = array<i64: 128, 128>}, {pipeline_mode = #tpu.pipeline_mode<synchronous>, transform_indices = @transform_4, window_bounds = array<i64: 1, 128>}, {transform_indices = @transform_5, window_bounds = array<i64: 16, 128>}]} {
    %c0 = arith.constant 0 : index
    %c0_0 = arith.constant 0 : index
    %0 = vector.load %arg1[%c0, %c0_0] : memref<16x32xf32, #tpu.memory_space<vmem>>, vector<16x32xf32>
    %c0_1 = arith.constant 0 : index
    %c0_2 = arith.constant 0 : index
    %1 = vector.load %arg2[%c0_1, %c0_2] : memref<32x128xf32, #tpu.memory_space<vmem>>, vector<32x128xf32>
    %cst = arith.constant dense<0.000000e+00> : vector<16x128xf32>
    %2 = tpu.matmul %0, %1, %cst {dimension_numbers = #tpu.dot_dimension_numbers<[1], [0], [0], [1], [0, 0, 1, 1], [], []>} : vector<16x32xf32>, vector<32x128xf32>, vector<16x128xf32> -> vector<16x128xf32>
    %c0_3 = arith.constant 0 : index
    %c0_4 = arith.constant 0 : index
    %3 = vector.load %arg3[%c0_3, %c0_4] : memref<1x128xf32, #tpu.memory_space<vmem>>, vector<1x128xf32>
    %4 = vector.broadcast %3 : vector<1x128xf32> to vector<16x128xf32>
    %5 = arith.addf %2, %4 : vector<16x128xf32>
    %cst_5 = arith.constant 5.000000e-01 : f32
    %6 = vector.broadcast %cst_5 : f32 to vector<16x128xf32>
    %7 = arith.mulf %6, %5 : vector<16x128xf32>
    %cst_6 = arith.constant 0.707106769 : f32
    %8 = vector.broadcast %cst_6 : f32 to vector<16x128xf32>
    %9 = arith.mulf %5, %8 : vector<16x128xf32>
    %10 = math.erf %9 : vector<16x128xf32>
    %cst_7 = arith.constant 1.000000e+00 : f32
    %11 = vector.broadcast %cst_7 : f32 to vector<16x128xf32>
    %12 = arith.addf %11, %10 : vector<16x128xf32>
    %13 = arith.mulf %7, %12 : vector<16x128xf32>
    %c0_8 = arith.constant 0 : index
    %c0_9 = arith.constant 0 : index
    %14 = vector.load %arg4[%c0_8, %c0_9] : memref<128x128xf32, #tpu.memory_space<vmem>>, vector<128x128xf32>
    %cst_10 = arith.constant dense<0.000000e+00> : vector<16x128xf32>
    %15 = tpu.matmul %13, %14, %cst_10 {dimension_numbers = #tpu.dot_dimension_numbers<[1], [0], [0], [1], [0, 0, 1, 1], [], []>} : vector<16x128xf32>, vector<128x128xf32>, vector<16x128xf32> -> vector<16x128xf32>
    %c0_11 = arith.constant 0 : index
    %c0_12 = arith.constant 0 : index
    %16 = vector.load %arg5[%c0_11, %c0_12] : memref<1x128xf32, #tpu.memory_space<vmem>>, vector<1x128xf32>
    %17 = vector.broadcast %16 : vector<1x128xf32> to vector<16x128xf32>
    %18 = arith.addf %15, %17 : vector<16x128xf32>
    %c0_13 = arith.constant 0 : index
    %c0_14 = arith.constant 0 : index
    %19 = vector.load %arg6[%c0_13, %c0_14] : memref<16x128xf32, #tpu.memory_space<vmem>>, vector<16x128xf32>
    tpu.vector_store %arg6[%c0_13, %c0_14], %18 {strides = array<i32>} : memref<16x128xf32, #tpu.memory_space<vmem>>, vector<16x128xf32>,
    return
  }
  func.func @transform_0(%arg0: i32) -> (i32, i32) {
    %c0_i32 = arith.constant 0 : i32
    %c0_i32_0 = arith.constant 0 : i32
    return %arg0, %c0_i32 : i32, i32
  }
  func.func @transform_1(%arg0: i32) -> (i32, i32) {
    %c0_i32 = arith.constant 0 : i32
    %c0_i32_0 = arith.constant 0 : i32
    %c0_i32_1 = arith.constant 0 : i32
    return %c0_i32, %c0_i32_0 : i32, i32
  }
  func.func @transform_2(%arg0: i32) -> (i32, i32) {
    %c0_i32 = arith.constant 0 : i32
    %c0_i32_0 = arith.constant 0 : i32
    %c0_i32_1 = arith.constant 0 : i32
    return %c0_i32, %c0_i32_0 : i32, i32
  }
  func.func @transform_3(%arg0: i32) -> (i32, i32) {
    %c0_i32 = arith.constant 0 : i32
    %c0_i32_0 = arith.constant 0 : i32
    %c0_i32_1 = arith.constant 0 : i32
    return %c0_i32, %c0_i32_0 : i32, i32
  }
  func.func @transform_4(%arg0: i32) -> (i32, i32) {
    %c0_i32 = arith.constant 0 : i32
    %c0_i32_0 = arith.constant 0 : i32
    %c0_i32_1 = arith.constant 0 : i32
    return %c0_i32, %c0_i32_0 : i32, i32
  }
  func.func @transform_5(%arg0: i32) -> (i32, i32) {
    %c0_i32 = arith.constant 0 : i32
    %c0_i32_0 = arith.constant 0 : i32
    return %arg0, %c0_i32 : i32, i32
  }
}

</mosaic_0001>

<bundles_post_ra>
// kernel: mlp_pallas.1
= control target key start
LH: loop header
LB: loop body
LE: loop exit
PB: predicated region body
PF: predicated region fallthrough
CT: control target
= control target key end

     0   :  { %vm33_vm0 = vcmask 261120   ;;  %s457_s1 = inlined_call_operand.vmem [shape: f32[32,128], index: 1, kind: input, shape index: {}]   ;;  %s458_s0 = inlined_call_operand.vmem [shape: f32[16,32], index: 0, kind: input, shape index: {}]   ;;  %s459_s3 = inlined_call_operand.vmem [shape: f32[128,128], index: 3, kind: input, shape index: {}]   ;;  %s460_s2 = inlined_call_operand.vmem [shape: f32[1,128], index: 2, kind: input, shape index: {}]   ;;  %s461_s4 = inlined_call_operand.vmem [shape: f32[1,128], index: 4, kind: input, shape index: {}]   ;;  %s462_s5 = inlined_call_operand.vmem [shape: f32[16,128], index: 5, kind: output, shape index: {}]  }
   0x1   :  { %v22_v0 = vld [vmem:[%s457_s1] sm:$0xff]  ;;  %v23_v1 = vld [vmem:[%s457_s1 + $0x8] sm:$0xff]  ;;  %v24_v2 = vld [vmem:[%s457_s1 + $0x10] sm:$0xff] }
   0x2   :  { %v303_v3 = vpack.c.bf16 %v23_v1, %v22_v0  ;;  %v25_v4 = vld [vmem:[%s457_s1 + $0x18] sm:$0xff]  ;;  %v20_v5 = vld [vmem:[%s458_s0] sm:$0xff]  ;;  %v126_v8 = vld [vmem:[%s459_s3 + $0x8] sm:$0xff] }
   0x3   :  { %v307_v6 = vpack.c.bf16 %v25_v4, %v24_v2  ;;  %265 = vmatprep.mubr.msk.f32.mxu0 %vm33_vm0, %v20_v5  ;;  %v125_v7 = vld [vmem:[%s459_s3] sm:$0xff]  ;;  %v127_v9 = vld [vmem:[%s459_s3 + $0x10] sm:$0xff]  ;;  %v128_v11 = vld [vmem:[%s459_s3 + $0x18] sm:$0xff] }
   0x4   :  { %304 = vmatprep.subr.bf16.mxu0 %v303_v3  ;;  %v311_v10 = vpack.c.bf16 %v126_v8, %v125_v7  ;;  %v315_v12 = vpack.c.bf16 %v128_v11, %v127_v9  ;;  %v129_v13 = vld [vmem:[%s459_s3 + $0x20] sm:$0xff]  ;;  %v130_v14 = vld [vmem:[%s459_s3 + $0x28] sm:$0xff]  ;;  %v131_v17 = vld [vmem:[%s459_s3 + $0x30] sm:$0xff] }
   0x5   :  { %306 = vmatpush3.bf16.msra.mxu0 %v303_v3  ;;  %v319_v15 = vpack.c.bf16 %v130_v14, %v129_v13  ;;  %v21_v16 = vld [vmem:[%s458_s0 + $0x8] sm:$0xff]  ;;  %v132_v18 = vld [vmem:[%s459_s3 + $0x38] sm:$0xff]  ;;  %v133_v20 = vld [vmem:[%s459_s3 + $0x40] sm:$0xff] }
   0x6   :  { %308 = vmatprep.subr.bf16.mxu0 %v307_v6  ;;  %312 = vmatprep.subr.bf16.mxu1 %v311_v10  ;;  %v323_v19 = vpack.c.bf16 %v132_v18, %v131_v17  ;;  %v134_v21 = vld [vmem:[%s459_s3 + $0x48] sm:$0xff]  ;;  %v135_v23 = vld [vmem:[%s459_s3 + $0x50] sm:$0xff]  ;;  %v136_v24 = vld [vmem:[%s459_s3 + $0x58] sm:$0xff] }
   0x7   :  { %314 = vmatpush3.bf16.msra.mxu1 %v311_v10  ;;  %v327_v22 = vpack.c.bf16 %v134_v21, %v133_v20  ;;  %v331_v25 = vpack.c.bf16 %v136_v24, %v135_v23  ;;  %v137_v26 = vld [vmem:[%s459_s3 + $0x60] sm:$0xff]  ;;  %v138_v27 = vld [vmem:[%s459_s3 + $0x68] sm:$0xff]  ;;  %v139_v29 = vld [vmem:[%s459_s3 + $0x70] sm:$0xff] }
   0x8   :  { %316 = vmatprep.subr.bf16.mxu1 %v315_v12  ;;  %v335_v28 = vpack.c.bf16 %v138_v27, %v137_v26  ;;  %v140_v30 = vld [vmem:[%s459_s3 + $0x78] sm:$0xff]  ;;  %v229_v32 = vld [vmem:[%s460_s2] ss:$0 sm:$0xff] }
   0x9   :  { %310 = vmatpush3.bf16.msra.mxu0 %v307_v6  ;;  %v339_v31 = vpack.c.bf16 %v140_v30, %v139_v29  ;;  %v232_v47 = vld [vmem:[%s461_s4] ss:$0 sm:$0xff] }
   0xb   :  { %318 = vmatpush3.bf16.msra.mxu1 %v315_v12 }
   0xc   :  { %266 = vmatmul.mubr.msk.f32.vlgmr.msra.gmra.mrb[0].mxu0 %vm33_vm0, %v21_v16  ;;  %320 = vmatprep.subr.bf16.mxu1 %v319_v15 }
   0xf   :  { %322 = vmatpush3.bf16.msra.mxu1 %v319_v15 }
  0x10   :  { %324 = vmatprep.subr.bf16.mxu1 %v323_v19 }
  0x13   :  { %326 = vmatpush3.bf16.msra.mxu1 %v323_v19 }
  0x14   :  { %328 = vmatprep.subr.bf16.mxu1 %v327_v22 }
  0x17   :  { %330 = vmatpush3.bf16.msra.mxu1 %v327_v22 }
  0x18   :  { %332 = vmatprep.subr.bf16.mxu1 %v331_v25 }
  0x1b   :  { %334 = vmatpush3.bf16.msra.mxu1 %v331_v25 }
  0x1c   :  { %336 = vmatprep.subr.bf16.mxu1 %v335_v28 }
  0x1f   :  { %338 = vmatpush3.bf16.msra.mxu1 %v335_v28 }
  0x20   :  { %340 = vmatprep.subr.bf16.mxu1 %v339_v31 }
  0x23   :  { %342 = vmatpush3.bf16.msra.mxu1 %v339_v31 }
  0xdf   :  { %v267_v33 = vpop.f32.mrb[0].mxu0 }
  0xe0   :  { %v112_v34 = vadd.f32 %v267_v33, %v229_v32  ;;  %v106_v35 = vpop.f32.mrb[1].mxu0 }
  0xe1   :  { %v107_v36 = vadd.f32 %v229_v32, %v106_v35 }
  0xe2   :  { %v118_v37 = vmul.f32 0.70710677, %v112_v34  ;;  %v116_v44 = vmul.f32 0.5, %v112_v34 }
  0xe3   :  { %v117_v38 = vmul.f32 0.70710677, %v107_v36  ;;  %v115_v42 = vmul.f32 0.5, %v107_v36 }
  0xe4   :  { %343 = verf.f32 %v118_v37 }
  0xe5   :  { %345 = verf.f32 %v117_v38 }
  0xee   :  { %v344_v39 = vpop.eup %343 }
  0xef   :  { %v346_v40 = vpop.eup %345  ;;  %v122_v41 = vadd.f32 1.0, %v344_v39 }
  0xf0   :  { %v121_v43 = vadd.f32 1.0, %v346_v40 }
  0xf1   :  { %v124_v46 = vmul.f32 %v122_v41, %v116_v44 }
  0xf2   :  { %v123_v45 = vmul.f32 %v121_v43, %v115_v42 }
  0xf4   :  { %300 = vmatprep.mubr.f32.mxu1 %v123_v45 }
  0xf5   :  { %301 = vmatmul.mubr.f32.vlgmr.msra.gmra.mrb[0].mxu1 %v124_v46 }
 0x1c8   :  { %v302_v48 = vpop.f32.mrb[0].mxu1 }
 0x1c9   :  { %v220_v49 = vadd.f32 %v302_v48, %v232_v47  ;;  %v214_v50 = vpop.f32.mrb[1].mxu1 }
 0x1ca   :  { %v215_v51 = vadd.f32 %v232_v47, %v214_v50 }
 0x1cb   :  { %224 = vst [vmem:[%s462_s5 + $0x8] sm:$0xff] %v220_v49 }
 0x1cc   :  { %223 = vst [vmem:[%s462_s5] sm:$0xff] %v215_v51 }

</bundles_post_ra>
